<compile_context>
chip_gen: v5e
topology: v5e:2x2
jax: 0.10.0
libtpu: 0.0.40
codegen_flags: <defaults>
</compile_context>

<pallas_src>
import jax
import jax.numpy as jnp
from jax.experimental import pallas as pl
from jax.experimental.pallas import tpu as pltpu

IN_DIM = 100
HID_DIM = 200
OUT_DIM = 784

LN_EPS = 1e-5          # nn.LayerNorm default eps
LRELU_SLOPE = 0.02
TILE_M = 512           # row tile for large batches (safe for v5e scoped VMEM)


def _round_up(x, m):
    return (x + m - 1) // m * m


def _choose_tile_m(batch):
    if batch >= 2 * TILE_M:
        return TILE_M
    # Mid/small batches: aim for >=2 grid steps so v7x's two TensorCores both
    # get work; keep the tile sublane-aligned (multiple of 8).
    return max(8, _round_up((batch + 1) // 2, 8))


def mnist_generator_kernel(x_ref, w1_ref, b1_ref, g_ref, beta_ref,
                           w2_ref, b2_ref, o_ref):
    # x tile: [tile_m, 100] f32
    x = x_ref[...]

    # Linear(100, 200): bf16 inputs on the MXU, f32 accumulation.
    h = jnp.dot(x.astype(jnp.bfloat16), w1_ref[...],
                preferred_element_type=jnp.float32)            # [tile_m, 200]
    h = h + b1_ref[...]

    # LeakyReLU(0.02): exact as a max since the slope < 1 (single VPU op).
    h = jnp.maximum(h, LRELU_SLOPE * h)

    # LayerNorm(200): fused single-pass stats (sum and sum of squares).
    s1 = jnp.sum(h, axis=-1, keepdims=True)                    # [tile_m, 1]
    s2 = jnp.sum(h * h, axis=-1, keepdims=True)                # [tile_m, 1]
    mean = s1 * (1.0 / HID_DIM)
    var = s2 * (1.0 / HID_DIM) - mean * mean
    var = jnp.maximum(var, 0.0)                                # guard cancellation
    h = (h - mean) * jax.lax.rsqrt(var + LN_EPS)
    h = h * g_ref[...] + beta_ref[...]

    # Linear(200, 784)
    y = jnp.dot(h.astype(jnp.bfloat16), w2_ref[...],
                preferred_element_type=jnp.float32)            # [tile_m, 784]
    y = y + b2_ref[...]

    # Sigmoid via tanh: exact, one EUP transcendental per element.
    o_ref[...] = (0.5 * jnp.tanh(0.5 * y) + 0.5).astype(o_ref.dtype)


def prepare_params(w1, b1, gamma, beta, w2, b2):
    """One-time parameter prep (cast/reshape); call at load/update time only."""
    return dict(
        w1=w1.astype(jnp.bfloat16),                            # [100, 200]
        b1=b1.reshape(1, -1).astype(jnp.float32),              # [1, 200]
        gamma=gamma.reshape(1, -1).astype(jnp.float32),        # [1, 200]
        beta=beta.reshape(1, -1).astype(jnp.float32),          # [1, 200]
        w2=w2.astype(jnp.bfloat16),                            # [200, 784]
        b2=b2.reshape(1, -1).astype(jnp.float32),              # [1, 784]
    )


def mnist_generator_forward(x, params):
    """x: [B, 100] float; params: output of prepare_params()."""
    B = x.shape[0]
    x = x.astype(jnp.float32)

    tile_m = _choose_tile_m(B)
    grid = (pl.cdiv(B, tile_m),)

    cost = pl.CostEstimate(
        flops=2 * B * (IN_DIM * HID_DIM + HID_DIM * OUT_DIM),
        transcendentals=B * (1 + OUT_DIM),                 # rsqrt + tanh per out
        bytes_accessed=(B * IN_DIM * 4
                        + params["w1"].size * 2 + params["w2"].size * 2
                        + (params["b1"].size + params["gamma"].size
                           + params["beta"].size + params["b2"].size) * 4
                        + B * OUT_DIM * 4),
    )

    out = pl.pallas_call(
        mnist_generator_kernel,
        out_shape=jax.ShapeDtypeStruct((B, OUT_DIM), jnp.float32),
        grid=grid,
        in_specs=[
            pl.BlockSpec((tile_m, IN_DIM), lambda i: (i, 0)),     # x (row tiles)
            pl.BlockSpec((IN_DIM, HID_DIM), lambda i: (0, 0)),    # w1 (resident)
            pl.BlockSpec((1, HID_DIM), lambda i: (0, 0)),         # b1
            pl.BlockSpec((1, HID_DIM), lambda i: (0, 0)),         # gamma
            pl.BlockSpec((1, HID_DIM), lambda i: (0, 0)),         # beta
            pl.BlockSpec((HID_DIM, OUT_DIM), lambda i: (0, 0)),   # w2 (resident)
            pl.BlockSpec((1, OUT_DIM), lambda i: (0, 0)),         # b2
        ],
        out_specs=pl.BlockSpec((tile_m, OUT_DIM), lambda i: (i, 0)),
        compiler_params=pltpu.CompilerParams(
            dimension_semantics=("parallel",)),   # split row tiles over TCs
        cost_estimate=cost,
    )(x, params["w1"], params["b1"], params["gamma"], params["beta"],
      params["w2"], params["b2"])

    return out


def reference_forward(x, w1, b1, gamma, beta, w2, b2):
    """Pure-JAX reference mirroring the kernel's precision choices
    (bf16 matmul inputs, f32 accumulation / elementwise)."""
    b1 = b1.reshape(1, -1)
    gamma = gamma.reshape(1, -1)
    beta = beta.reshape(1, -1)
    b2 = b2.reshape(1, -1)
    h = jnp.dot(x.astype(jnp.bfloat16), w1.astype(jnp.bfloat16),
                preferred_element_type=jnp.float32) + b1
    h = jnp.where(h >= 0, h, LRELU_SLOPE * h)
    mean = jnp.mean(h, axis=-1, keepdims=True)
    var = jnp.mean((h - mean) ** 2, axis=-1, keepdims=True)
    h = (h - mean) * jax.lax.rsqrt(var + LN_EPS)
    h = h * gamma + beta
    y = jnp.dot(h.astype(jnp.bfloat16), w2.astype(jnp.bfloat16),
                preferred_element_type=jnp.float32) + b2
    return jax.nn.sigmoid(y)


if __name__ == "__main__":
    key = jax.random.PRNGKey(0)
    kx, kw1, kb1, kw2, kb2 = jax.random.split(key, 5)

    B = 8
    # Deterministic synthetic parameters (PyTorch-like small uniform init).
    x = jax.random.normal(kx, (B, IN_DIM), dtype=jnp.float32)
    lim1 = 1.0 / (IN_DIM ** 0.5)
    w1 = jax.random.uniform(kw1, (IN_DIM, HID_DIM), jnp.float32, -lim1, lim1)
    b1 = jax.random.uniform(kb1, (HID_DIM,), jnp.float32, -lim1, lim1)
    gamma = jnp.ones((HID_DIM,), jnp.float32)    # LayerNorm default weight
    beta = jnp.zeros((HID_DIM,), jnp.float32)    # LayerNorm default bias
    lim2 = 1.0 / (HID_DIM ** 0.5)
    w2 = jax.random.uniform(kw2, (HID_DIM, OUT_DIM), jnp.float32, -lim2, lim2)
    b2 = jax.random.uniform(kb2, (OUT_DIM,), jnp.float32, -lim2, lim2)

    params = prepare_params(w1, b1, gamma, beta, w2, b2)   # one-time prep

    out = mnist_generator_forward(x, params)
    out = jax.block_until_ready(out)

    ref = reference_forward(x, w1, b1, gamma, beta, w2, b2)
    assert out.shape == (B, OUT_DIM)
    assert bool(jnp.all(jnp.isfinite(out)))
    # Tolerance covers bf16 rounding + accumulation-order differences only
    # (sigmoid is now exact in the kernel).
    assert jnp.allclose(out, ref, atol=2e-3, rtol=0), "mismatch vs JAX reference"

    # TODO(synk): BCELoss / Adam optimiser / train() bookkeeping are host-side
    # training code, not part of the forward pass, so they are not kernelized.
    print("KERNEL_OK")
</pallas_src>

<mosaic_0001>
module attributes {stable_mosaic.version = 11 : i64} {
  func.func @mnist_generator_kernel(%arg0: i32, %arg1: memref<8x100xf32, #tpu.memory_space<vmem>>, %arg2: memref<100x200xbf16, #tpu.memory_space<vmem>>, %arg3: memref<1x200xf32, #tpu.memory_space<vmem>>, %arg4: memref<1x200xf32, #tpu.memory_space<vmem>>, %arg5: memref<1x200xf32, #tpu.memory_space<vmem>>, %arg6: memref<200x784xbf16, #tpu.memory_space<vmem>>, %arg7: memref<1x784xf32, #tpu.memory_space<vmem>>, %arg8: memref<8x784xf32, #tpu.memory_space<vmem>>) attributes {dimension_semantics = [#tpu.dimension_semantics<parallel>], iteration_bounds = array<i64: 1>, scalar_prefetch = 0 : i64, scratch_operands = 0 : i64, tpu.core_type = #tpu.core_type<tc>, window_params = [{transform_indices = @transform_0, window_bounds = array<i64: 8, 100>}, {pipeline_mode = #tpu.pipeline_mode<synchronous>, transform_indices = @transform_1, window_bounds = array<i64: 100, 200>}, {pipeline_mode = #tpu.pipeline_mode<synchronous>, transform_indices = @transform_2, window_bounds = array<i64: 1, 200>}, {pipeline_mode = #tpu.pipeline_mode<synchronous>, transform_indices = @transform_3, window_bounds = array<i64: 1, 200>}, {pipeline_mode = #tpu.pipeline_mode<synchronous>, transform_indices = @transform_4, window_bounds = array<i64: 1, 200>}, {pipeline_mode = #tpu.pipeline_mode<synchronous>, transform_indices = @transform_5, window_bounds = array<i64: 200, 784>}, {pipeline_mode = #tpu.pipeline_mode<synchronous>, transform_indices = @transform_6, window_bounds = array<i64: 1, 784>}, {transform_indices = @transform_7, window_bounds = array<i64: 8, 784>}]} {
    %c0 = arith.constant 0 : index
    %c0_0 = arith.constant 0 : index
    %0 = vector.load %arg1[%c0, %c0_0] : memref<8x100xf32, #tpu.memory_space<vmem>>, vector<8x100xf32>
    %1 = arith.truncf %0 : vector<8x100xf32> to vector<8x100xbf16>
    %c0_1 = arith.constant 0 : index
    %c0_2 = arith.constant 0 : index
    %2 = vector.load %arg2[%c0_1, %c0_2] : memref<100x200xbf16, #tpu.memory_space<vmem>>, vector<100x200xbf16>
    %cst = arith.constant dense<0.000000e+00> : vector<8x200xf32>
    %3 = tpu.matmul %1, %2, %cst {dimension_numbers = #tpu.dot_dimension_numbers<[1], [0], [0], [1], [0, 0, 1, 1], [], []>} : vector<8x100xbf16>, vector<100x200xbf16>, vector<8x200xf32> -> vector<8x200xf32>
    %c0_3 = arith.constant 0 : index
    %c0_4 = arith.constant 0 : index
    %4 = vector.load %arg3[%c0_3, %c0_4] : memref<1x200xf32, #tpu.memory_space<vmem>>, vector<1x200xf32>
    %5 = vector.broadcast %4 : vector<1x200xf32> to vector<8x200xf32>
    %6 = arith.addf %3, %5 : vector<8x200xf32>
    %cst_5 = arith.constant 2.000000e-02 : f32
    %7 = vector.broadcast %cst_5 : f32 to vector<8x200xf32>
    %8 = arith.mulf %7, %6 : vector<8x200xf32>
    %9 = arith.maximumf %6, %8 : vector<8x200xf32>
    %cst_6 = arith.constant dense<0.000000e+00> : vector<8xf32>
    %10 = vector.multi_reduction <add>, %9, %cst_6 [1] : vector<8x200xf32> to vector<8xf32>
    %11 = vector.shape_cast %10 : vector<8xf32> to vector<8x1xf32>
    %12 = arith.mulf %9, %9 : vector<8x200xf32>
    %cst_7 = arith.constant dense<0.000000e+00> : vector<8xf32>
    %13 = vector.multi_reduction <add>, %12, %cst_7 [1] : vector<8x200xf32> to vector<8xf32>
    %14 = vector.shape_cast %13 : vector<8xf32> to vector<8x1xf32>
    %cst_8 = arith.constant 5.000000e-03 : f32
    %15 = vector.broadcast %cst_8 : f32 to vector<8x1xf32>
    %16 = arith.mulf %11, %15 : vector<8x1xf32>
    %cst_9 = arith.constant 5.000000e-03 : f32
    %17 = vector.broadcast %cst_9 : f32 to vector<8x1xf32>
    %18 = arith.mulf %14, %17 : vector<8x1xf32>
    %19 = arith.mulf %16, %16 : vector<8x1xf32>
    %20 = arith.subf %18, %19 : vector<8x1xf32>
    %cst_10 = arith.constant 0.000000e+00 : f32
    %21 = vector.broadcast %cst_10 : f32 to vector<8x1xf32>
    %22 = arith.maximumf %20, %21 : vector<8x1xf32>
    %23 = vector.broadcast %16 : vector<8x1xf32> to vector<8x200xf32>
    %24 = arith.subf %9, %23 : vector<8x200xf32>
    %cst_11 = arith.constant 9.99999974E-6 : f32
    %25 = vector.broadcast %cst_11 : f32 to vector<8x1xf32>
    %26 = arith.addf %22, %25 : vector<8x1xf32>
    %27 = math.rsqrt %26 : vector<8x1xf32>
    %28 = vector.broadcast %27 : vector<8x1xf32> to vector<8x200xf32>
    %29 = arith.mulf %24, %28 : vector<8x200xf32>
    %c0_12 = arith.constant 0 : index
    %c0_13 = arith.constant 0 : index
    %30 = vector.load %arg4[%c0_12, %c0_13] : memref<1x200xf32, #tpu.memory_space<vmem>>, vector<1x200xf32>
    %31 = vector.broadcast %30 : vector<1x200xf32> to vector<8x200xf32>
    %32 = arith.mulf %29, %31 : vector<8x200xf32>
    %c0_14 = arith.constant 0 : index
    %c0_15 = arith.constant 0 : index
    %33 = vector.load %arg5[%c0_14, %c0_15] : memref<1x200xf32, #tpu.memory_space<vmem>>, vector<1x200xf32>
    %34 = vector.broadcast %33 : vector<1x200xf32> to vector<8x200xf32>
    %35 = arith.addf %32, %34 : vector<8x200xf32>
    %36 = arith.truncf %35 : vector<8x200xf32> to vector<8x200xbf16>
    %c0_16 = arith.constant 0 : index
    %c0_17 = arith.constant 0 : index
    %37 = vector.load %arg6[%c0_16, %c0_17] : memref<200x784xbf16, #tpu.memory_space<vmem>>, vector<200x784xbf16>
    %cst_18 = arith.constant dense<0.000000e+00> : vector<8x784xf32>
    %38 = tpu.matmul %36, %37, %cst_18 {dimension_numbers = #tpu.dot_dimension_numbers<[1], [0], [0], [1], [0, 0, 1, 1], [], []>} : vector<8x200xbf16>, vector<200x784xbf16>, vector<8x784xf32> -> vector<8x784xf32>
    %c0_19 = arith.constant 0 : index
    %c0_20 = arith.constant 0 : index
    %39 = vector.load %arg7[%c0_19, %c0_20] : memref<1x784xf32, #tpu.memory_space<vmem>>, vector<1x784xf32>
    %40 = vector.broadcast %39 : vector<1x784xf32> to vector<8x784xf32>
    %41 = arith.addf %38, %40 : vector<8x784xf32>
    %cst_21 = arith.constant 5.000000e-01 : f32
    %42 = vector.broadcast %cst_21 : f32 to vector<8x784xf32>
    %43 = arith.mulf %42, %41 : vector<8x784xf32>
    %44 = math.tanh %43 : vector<8x784xf32>
    %cst_22 = arith.constant 5.000000e-01 : f32
    %45 = vector.broadcast %cst_22 : f32 to vector<8x784xf32>
    %46 = arith.mulf %45, %44 : vector<8x784xf32>
    %cst_23 = arith.constant 5.000000e-01 : f32
    %47 = vector.broadcast %cst_23 : f32 to vector<8x784xf32>
    %48 = arith.addf %46, %47 : vector<8x784xf32>
    %c0_24 = arith.constant 0 : index
    %c0_25 = arith.constant 0 : index
    %49 = vector.load %arg8[%c0_24, %c0_25] : memref<8x784xf32, #tpu.memory_space<vmem>>, vector<8x784xf32>
    tpu.vector_store %arg8[%c0_24, %c0_25], %48 {strides = array<i32>} : memref<8x784xf32, #tpu.memory_space<vmem>>, vector<8x784xf32>,
    return
  }
  func.func @transform_0(%arg0: i32) -> (i32, i32) {
    %c0_i32 = arith.constant 0 : i32
    %c0_i32_0 = arith.constant 0 : i32
    return %arg0, %c0_i32 : i32, i32
  }
  func.func @transform_1(%arg0: i32) -> (i32, i32) {
    %c0_i32 = arith.constant 0 : i32
    %c0_i32_0 = arith.constant 0 : i32
    %c0_i32_1 = arith.constant 0 : i32
    return %c0_i32, %c0_i32_0 : i32, i32
  }
  func.func @transform_2(%arg0: i32) -> (i32, i32) {
    %c0_i32 = arith.constant 0 : i32
    %c0_i32_0 = arith.constant 0 : i32
    %c0_i32_1 = arith.constant 0 : i32
    return %c0_i32, %c0_i32_0 : i32, i32
  }
  func.func @transform_3(%arg0: i32) -> (i32, i32) {
    %c0_i32 = arith.constant 0 : i32
    %c0_i32_0 = arith.constant 0 : i32
    %c0_i32_1 = arith.constant 0 : i32
    return %c0_i32, %c0_i32_0 : i32, i32
  }
  func.func @transform_4(%arg0: i32) -> (i32, i32) {
    %c0_i32 = arith.constant 0 : i32
    %c0_i32_0 = arith.constant 0 : i32
    %c0_i32_1 = arith.constant 0 : i32
    return %c0_i32, %c0_i32_0 : i32, i32
  }
  func.func @transform_5(%arg0: i32) -> (i32, i32) {
    %c0_i32 = arith.constant 0 : i32
    %c0_i32_0 = arith.constant 0 : i32
    %c0_i32_1 = arith.constant 0 : i32
    return %c0_i32, %c0_i32_0 : i32, i32
  }
  func.func @transform_6(%arg0: i32) -> (i32, i32) {
    %c0_i32 = arith.constant 0 : i32
    %c0_i32_0 = arith.constant 0 : i32
    %c0_i32_1 = arith.constant 0 : i32
    return %c0_i32, %c0_i32_0 : i32, i32
  }
  func.func @transform_7(%arg0: i32) -> (i32, i32) {
    %c0_i32 = arith.constant 0 : i32
    %c0_i32_0 = arith.constant 0 : i32
    return %arg0, %c0_i32 : i32, i32
  }
}

</mosaic_0001>

<bundles_post_ra>
// kernel: tpu_custom_call.1
= control target key start
LH: loop header
LB: loop body
LE: loop exit
PB: predicated region body
PF: predicated region fallthrough
CT: control target
= control target key end

     0   :  { %12 = vsyncpa [#allocation3], 0  ;;  %s1820_s0 = inlined_call_operand.vmem [shape: f32[8,100], index: 0, kind: input, shape index: {}]   ;;  %s1821_s1 = inlined_call_operand.vmem [shape: bf16[100,200], index: 1, kind: input, shape index: {}]   ;;  %s1822_s2 = inlined_call_operand.vmem [shape: f32[1,200], index: 2, kind: input, shape index: {}]   ;;  %s1823_s3 = inlined_call_operand.vmem [shape: f32[1,200], index: 3, kind: input, shape index: {}]   ;;  %s1824_s4 = inlined_call_operand.vmem [shape: f32[1,200], index: 4, kind: input, shape index: {}]   ;;  %s1825_s5 = inlined_call_operand.hbm [shape: bf16[200,784], index: 5, kind: input, shape index: {}]   ;;  %s1826_s6 = inlined_call_operand.vmem [shape: f32[1,784], index: 6, kind: input, shape index: {}]   ;;  %s1827_s7 = inlined_call_operand.hbm [shape: f32[8,784], index: 7, kind: output, shape index: {}]  }
   0x1   :  { %13 = vsyncpa [#allocation4], 0  ;;  %s28_s26 = sshll.u32 %s1825_s5, 4  ;;  %s1607_s27 = smov [#allocation2]   ;;  %s29_s26 = int_to_ptr.hbm [resolvable:$true] %s28_s26 }
   0x2   :  { %s30_s28 = sshll.u32 %s1607_s27, 4  ;;  %s1608_s29 = smov 448   ;;  %s31_s28 = int_to_ptr.vmem [resolvable:$true] %s30_s28 }
   0x3   :  { %s1609_s30 = smov 28  }
   0x4   :  { %36 = dma.hbm_to_vmem [thread:$0]  %s29_s26, 11200, %s31_s28, [#allocation3], %s1608_s29, %s1608_s29, %s1609_s30  }
   0x5   :  { %1603 = dma.done.wait [#allocation3], 11200  }
   0x6   :  { %1604 = vsyncadd [#allocation3], 4294956096  ;;  %v58_v0 = vld [vmem:[%s1821_s1 + $0x60] sm:$0x33]  ;;  %vm134_vm0 = vcmask 1041408   ;;  %vm130_vm1 = vcmask 818176  }
   0x7   :  { %v102_v1 = vunpack.c.l.b16 %v58_v0  ;;  %v103_v2 = vunpack.c.h.b16 %v58_v0  ;;  %v1088_v3 = vld [vmem:[%s1821_s1 + $0x50] sm:$0xf]  ;;  %v1450_v6 = vld [vmem:[%s1821_s1 + $0x54] sm:$0xf0]  ;;  %v1449_v7 = vld [vmem:[%s1821_s1 + $0x54] sm:$0xf] }
   0x8   :  { %v1090_v8 = vld [vmem:[%s1821_s1 + $0x58] sm:$0xf0]  ;;  %v1089_v11 = vor.u32 %v1450_v6, %v1088_v3  ;;  %v1080_v13 = vld [vmem:[%s1821_s1 + $0x40] sm:$0xf]  ;;  %v1448_v14 = vld [vmem:[%s1821_s1 + $0x44] sm:$0xf0] }
   0x9   :  { %v116_v4 = vpack.c.b16 %v102_v1, %v102_v1  ;;  %v117_v5 = vpack.c.b16 %v103_v2, %v103_v2  ;;  %v1093_v12 = vor.u32 %v1449_v7, %v1090_v8  ;;  %v1447_v15 = vld [vmem:[%s1821_s1 + $0x44] sm:$0xf]  ;;  %v1082_v16 = vld [vmem:[%s1821_s1 + $0x48] sm:$0xf0]  ;;  %v1081_v17 = vor.u32 %v1448_v14, %v1080_v13  ;;  %v1072_v19 = vld [vmem:[%s1821_s1 + $0x30] sm:$0xf] }
   0xa   :  { %v1085_v18 = vor.u32 %v1447_v15, %v1082_v16  ;;  %v1446_v20 = vld [vmem:[%s1821_s1 + $0x34] sm:$0xf0]  ;;  %v1445_v21 = vld [vmem:[%s1821_s1 + $0x34] sm:$0xf]  ;;  %v1074_v22 = vld [vmem:[%s1821_s1 + $0x38] sm:$0xf0] }
   0xb   :  { %v136_v9 = vsel %vm134_vm0, %v116_v4, 0  ;;  %v139_v10 = vsel %vm134_vm0, %v117_v5, 0  ;;  %v1073_v23 = vor.u32 %v1446_v20, %v1072_v19  ;;  %v1077_v24 = vor.u32 %v1445_v21, %v1074_v22  ;;  %v1064_v25 = vld [vmem:[%s1821_s1 + $0x20] sm:$0xf]  ;;  %v1444_v26 = vld [vmem:[%s1821_s1 + $0x24] sm:$0xf0] }
   0xc   :  { %142 = vmatpush.bf16.msra.mxu0 %v136_v9  ;;  %155 = vmatpush.bf16.msra.mxu1 %v139_v10  ;;  %v1443_v27 = vld [vmem:[%s1821_s1 + $0x24] sm:$0xf]  ;;  %v1066_v28 = vld [vmem:[%s1821_s1 + $0x28] sm:$0xf0]  ;;  %v1065_v29 = vor.u32 %v1444_v26, %v1064_v25  ;;  %v1056_v31 = vld [vmem:[%s1821_s1 + $0x10] sm:$0xf] }
   0xd   :  { %v1069_v30 = vor.u32 %v1443_v27, %v1066_v28  ;;  %v1442_v32 = vld [vmem:[%s1821_s1 + $0x14] sm:$0xf0]  ;;  %v1441_v33 = vld [vmem:[%s1821_s1 + $0x14] sm:$0xf]  ;;  %v1058_v34 = vld [vmem:[%s1821_s1 + $0x18] sm:$0xf0] }
   0xe   :  { %v1057_v35 = vor.u32 %v1442_v32, %v1056_v31  ;;  %v1061_v36 = vor.u32 %v1441_v33, %v1058_v34  ;;  %v1048_v37 = vld [vmem:[%s1821_s1] sm:$0xf]  ;;  %v1440_v38 = vld [vmem:[%s1821_s1 + $0x4] sm:$0xf0]  ;;  %v1439_v39 = vld [vmem:[%s1821_s1 + $0x4] sm:$0xf] }
   0xf   :  { %v1050_v40 = vld [vmem:[%s1821_s1 + $0x8] sm:$0xf0]  ;;  %v1049_v41 = vor.u32 %v1440_v38, %v1048_v37  ;;  %v44_v43 = vld [vmem:[%s1820_s0] sm:$0xff]  ;;  %v1294_v45 = vld [vmem:[#allocation2 + $0x188] sm:$0xf]  ;;  %vm789_vm2 = vcmask 1043456  }
  0x10   :  { %143 = vmatpush.bf16.msra.mxu0 %v1089_v11  ;;  %156 = vmatpush.bf16.msra.mxu1 %v1093_v12  ;;  %v1053_v42 = vor.u32 %v1439_v39, %v1050_v40  ;;  %v45_v44 = vpack.c.bf16 %v44_v43, %v44_v43  ;;  %v1503_v46 = vld [vmem:[#allocation2 + $0x1a0] sm:$0xf0]  ;;  %v1302_v50 = vld [vmem:[#allocation2 + $0x190] sm:$0xf]  ;;  %v1504_v51 = vld [vmem:[#allocation2 + $0x1a8] sm:$0xf0] }
  0x11   :  { %v1732_v47 = vld [vmem:[#allocation2 + $0x2a0] sm:$0xff]  ;;  %v1295_v48 = vor.u32 %v1503_v46, %v1294_v45  ;;  %v1303_v52 = vor.u32 %v1504_v51, %v1302_v50  ;;  %vm171_vm3 = vcmask 588800   ;;  %v1266_v10 = vld [vmem:[#allocation2 + $0x150] sm:$0xf]  ;;  %v1496_v11 = vld [vmem:[#allocation2 + $0x168] sm:$0xf0] }
  0x12   :  { %v604_v49 = vunpack.c.l.b16 %v1732_v47  ;;  %v59_v55 = vld [vmem:[%s1822_s2] sm:$0x3]  ;;  %v1406_v12 = vld [vmem:[#allocation2 + $0x268] sm:$0xf]  ;;  %v1267_v13 = vor.u32 %v1496_v11, %v1266_v10  ;;  %v1531_v14 = vld [vmem:[#allocation2 + $0x280] sm:$0xf0]  ;;  %v605_v31 = vunpack.c.h.b16 %v1732_v47 }
  0x13   :  { %811 = vmatpush.bf16.msra.mxu2 %v1295_v48  ;;  %v61_v56 = vperm.slane %v59_v55, 0  ;;  %v62_v57 = vperm.slane %v59_v55, 1  ;;  %v1274_v15 = vld [vmem:[#allocation2 + $0x158] sm:$0xf]  ;;  %v1497_v16 = vld [vmem:[#allocation2 + $0x170] sm:$0xf0] }
  0x14   :  { %144 = vmatpush.bf16.msra.mxu0 %v1081_v17  ;;  %157 = vmatpush.bf16.msra.mxu1 %v1085_v18  ;;  %v695_v53 = vpack.c.b16 %v604_v49, %v604_v49  ;;  %v1407_v17 = vor.u32 %v1531_v14, %v1406_v12  ;;  %v1275_v18 = vor.u32 %v1497_v16, %v1274_v15  ;;  %v1238_v19 = vld [vmem:[#allocation2 + $0x118] sm:$0xf]  ;;  %v1489_v20 = vld [vmem:[#allocation2 + $0x130] sm:$0xf0]  ;;  %v1378_v21 = vld [vmem:[#allocation2 + $0x230] sm:$0xf] }
  0x15   :  { %v1239_v22 = vor.u32 %v1489_v20, %v1238_v19  ;;  %v1490_v25 = vld [vmem:[#allocation2 + $0x138] sm:$0xf0]  ;;  %v1210_v28 = vld [vmem:[#allocation2 + $0xe0] sm:$0xf]  ;;  %v1517_v33 = vld [vmem:[#allocation2 + $0x210] sm:$0xf0]  ;;  %v696_v37 = vpack.c.b16 %v605_v31, %v605_v31 }
  0x16   :  { %v791_v54 = vsel %vm789_vm2, %v695_v53, 0  ;;  %v1218_v34 = vld [vmem:[#allocation2 + $0xe8] sm:$0xf]  ;;  %v1322_v43 = vld [vmem:[#allocation2 + $0x1c0] sm:$0xf]  ;;  %s1036_s17 = sshll.u32 %s1827_s7, 4  ;;  %s1037_s17 = int_to_ptr.hbm [resolvable:$true] %s1036_s17 }
  0x17   :  { %827 = vmatpush.bf16.msra.mxu3 %v791_v54  ;;  %812 = vmatpush.bf16.msra.mxu2 %v1267_v13  ;;  %v794_v39 = vsel %vm789_vm2, %v696_v37, 0  ;;  %v1182_v40 = vld [vmem:[#allocation2 + $0xa8] sm:$0xf]  ;;  %v1500_v45 = vld [vmem:[#allocation2 + $0x18c] sm:$0xf]  ;;  %vm1027_vm7 = vcmask 130048  }
  0x18   :  { %145 = vmatpush.bf16.msra.mxu0 %v1073_v23  ;;  %158 = vmatpush.bf16.msra.mxu1 %v1077_v24  ;;  %v1524_v23 = vld [vmem:[#allocation2 + $0x248] sm:$0xf0]  ;;  %v1246_v24 = vld [vmem:[#allocation2 + $0x120] sm:$0xf]  ;;  %v1296_v47 = vld [vmem:[#allocation2 + $0x1a4] sm:$0xf0] }
  0x19   :  { %v1379_v26 = vor.u32 %v1524_v23, %v1378_v21  ;;  %v1247_v27 = vor.u32 %v1490_v25, %v1246_v24  ;;  %v1528_v48 = vld [vmem:[#allocation2 + $0x26c] sm:$0xf]  ;;  %v1408_v49 = vld [vmem:[#allocation2 + $0x284] sm:$0xf0]  ;;  %v1299_v50 = vor.u32 %v1500_v45, %v1296_v47  ;;  %v1154_v55 = vld [vmem:[#allocation2 + $0x70] sm:$0xf] }
  0x1a   :  { %v1411_v51 = vor.u32 %v1528_v48, %v1408_v49  ;;  %v1476_v53 = vld [vmem:[#allocation2 + $0xc8] sm:$0xf0]  ;;  %v1514_v10 = vld [vmem:[#allocation2 + $0x1fc] sm:$0xf]  ;;  %v1352_v12 = vld [vmem:[#allocation2 + $0x214] sm:$0xf0] }
  0x1b   :  { %828 = vmatpush.bf16.msra.mxu3 %v1407_v17  ;;  %813 = vmatpush.bf16.msra.mxu2 %v1239_v22  ;;  %v1134_v13 = vld [vmem:[#allocation2 + $0x40] sm:$0xf]  ;;  %v1462_v14 = vld [vmem:[#allocation2 + $0x58] sm:$0xf0]  ;;  %v1355_v15 = vor.u32 %v1514_v10, %v1352_v12  ;;  %v1753_v17 = vld [vmem:[#allocation2 + $0x2a8] sm:$0xff] }
  0x1c   :  { %146 = vmatpush.bf16.msra.mxu0 %v1065_v29  ;;  %159 = vmatpush.bf16.msra.mxu1 %v1069_v30  ;;  %v1482_v29 = vld [vmem:[#allocation2 + $0xf8] sm:$0xf0]  ;;  %v1350_v30 = vld [vmem:[#allocation2 + $0x1f8] sm:$0xf]  ;;  %v1135_v16 = vor.u32 %v1462_v14, %v1134_v13  ;;  %v1098_v19 = vld [vmem:[#allocation2] sm:$0xf]  ;;  %v606_v21 = vunpack.c.l.b16 %v1753_v17 }
  0x1d   :  { %v1211_v32 = vor.u32 %v1482_v29, %v1210_v28  ;;  %v1454_v20 = vld [vmem:[#allocation2 + $0x18] sm:$0xf0]  ;;  %v1479_v24 = vld [vmem:[#allocation2 + $0xe4] sm:$0xf]  ;;  %v1212_v25 = vld [vmem:[#allocation2 + $0xfc] sm:$0xf0] }
  0x1e   :  { %v1099_v23 = vor.u32 %v1454_v20, %v1098_v19  ;;  %v1324_v28 = vld [vmem:[#allocation2 + $0x1dc] sm:$0xf0]  ;;  %v1106_v29 = vld [vmem:[#allocation2 + $0x8] sm:$0xf]  ;;  %v697_v31 = vpack.c.b16 %v606_v21, %v606_v21  ;;  %v1494_v45 = vld [vmem:[#allocation2 + $0x15c] sm:$0xf] }
  0x1f   :  { %829 = vmatpush.bf16.msra.mxu3 %v1379_v26  ;;  %814 = vmatpush.bf16.msra.mxu2 %v1211_v32  ;;  %v1507_v26 = vld [vmem:[#allocation2 + $0x1c4] sm:$0xf]  ;;  %v1422_v49 = vld [vmem:[#allocation2 + $0x278] sm:$0xf]  ;;  %v1366_v13 = vld [vmem:[#allocation2 + $0x208] sm:$0xf] }
  0x20   :  { %147 = vmatpush.bf16.msra.mxu0 %v1057_v35  ;;  %160 = vmatpush.bf16.msra.mxu1 %v1061_v36  ;;  %v1483_v35 = vld [vmem:[#allocation2 + $0x100] sm:$0xf0]  ;;  %v1351_v36 = vor.u32 %v1517_v33, %v1350_v30  ;;  %v1327_v33 = vor.u32 %v1507_v26, %v1324_v28  ;;  %v797_v37 = vsel %vm789_vm2, %v697_v31, 0  ;;  %v1100_v19 = vld [vmem:[#allocation2 + $0x1c] sm:$0xf0] }
  0x21   :  { %v1219_v38 = vor.u32 %v1483_v35, %v1218_v34  ;;  %v1455_v30 = vld [vmem:[#allocation2 + $0x20] sm:$0xf0]  ;;  %v1501_v35 = vld [vmem:[#allocation2 + $0x194] sm:$0xf]  ;;  %v1330_v20 = vld [vmem:[#allocation2 + $0x1c8] sm:$0xf] }
  0x22   :  { %v1107_v34 = vor.u32 %v1455_v30, %v1106_v29  ;;  %v1519_v14 = vld [vmem:[#allocation2 + $0x220] sm:$0xf0]  ;;  %v1192_v28 = vld [vmem:[#allocation2 + $0xcc] sm:$0xf0] }
  0x23   :  { %830 = vmatpush.bf16.msra.mxu3 %v1351_v36  ;;  %v1304_v36 = vld [vmem:[#allocation2 + $0x1ac] sm:$0xf0] }
  0x24   :  { %148 = vmatpush.bf16.msra.mxu0 %v1049_v41  ;;  %161 = vmatpush.bf16.msra.mxu1 %v1053_v42  ;;  %v1475_v41 = vld [vmem:[#allocation2 + $0xc0] sm:$0xf0]  ;;  %v1338_v30 = vld [vmem:[#allocation2 + $0x1d0] sm:$0xf] }
  0x25   :  { %v1183_v42 = vor.u32 %v1475_v41, %v1182_v40  ;;  %v1472_v40 = vld [vmem:[#allocation2 + $0xac] sm:$0xf]  ;;  %v1184_v41 = vld [vmem:[#allocation2 + $0xc4] sm:$0xf0] }
  0x27   :  { %1094 = vmatmul.msk.bf16.vlgmr.msra.gmra.mxu0 %vm130_vm1, %v45_v44  ;;  %1095 = vmatmul.msk.bf16.vlgmr.msra.gmra.mxu1 %vm130_vm1, %v45_v44  ;;  %v1510_v44 = vld [vmem:[#allocation2 + $0x1d8] sm:$0xf0] }
  0x28   :  { %863 = vmatpush.bf16.msrb.mxu1 %v1303_v52  ;;  %853 = vmatpush.bf16.msrb.mxu0 %v794_v39  ;;  %v1323_v46 = vor.u32 %v1510_v44, %v1322_v43  ;;  %v1190_v52 = vld [vmem:[#allocation2 + $0xb0] sm:$0xf]  ;;  %v1187_v43 = vor.u32 %v1472_v40, %v1184_v41  ;;  %v1532_v44 = vld [vmem:[#allocation2 + $0x288] sm:$0xf0]  ;;  %v1136_v40 = vld [vmem:[#allocation2 + $0x5c] sm:$0xf0] }
  0x29   :  { %815 = vmatpush.bf16.msra.mxu2 %v1183_v42  ;;  %v1191_v54 = vor.u32 %v1476_v53, %v1190_v52  ;;  %v1414_v42 = vld [vmem:[#allocation2 + $0x270] sm:$0xf]  ;;  %v1465_v52 = vld [vmem:[#allocation2 + $0x74] sm:$0xf] }
  0x2a   :  { %831 = vmatpush.bf16.msra.mxu3 %v1323_v46  ;;  %v1276_v46 = vld [vmem:[#allocation2 + $0x174] sm:$0xf0]  ;;  %v1415_v47 = vor.u32 %v1532_v44, %v1414_v42  ;;  %v1156_v53 = vld [vmem:[#allocation2 + $0x8c] sm:$0xf0]  ;;  %v1452_v42 = vld [vmem:[#allocation2 + $0xc] sm:$0xf] }
  0x2b   :  { %v1279_v48 = vor.u32 %v1494_v45, %v1276_v46 }
  0x2c   :  { %864 = vmatpush.bf16.msrb.mxu1 %v1275_v18  ;;  %854 = vmatpush.bf16.msrb.mxu0 %v1411_v51  ;;  %v1755_v18 = vld [vmem:[#allocation2 + $0x2b0] sm:$0xff] }
  0x2d   :  { %v608_v22 = vunpack.c.l.b16 %v1755_v18 }
  0x2e   :  { %837 = vmatpush.bf16.msrb.mxu3 %v1299_v50  ;;  %v1533_v50 = vld [vmem:[#allocation2 + $0x290] sm:$0xf0] }
  0x2f   :  { %v699_v32 = vpack.c.b16 %v608_v22, %v608_v22  ;;  %v1423_v51 = vor.u32 %v1533_v50, %v1422_v49  ;;  %v202_v49 = vld [vmem:[%s1823_s3] sm:$0x3] }
  0x30   :  { %865 = vmatpush.bf16.msrb.mxu1 %v1247_v27  ;;  %v1215_v27 = vor.u32 %v1479_v24, %v1212_v25 }
  0x31   :  { %v803_v39 = vsel %vm789_vm2, %v699_v32, 0  ;;  %v1512_v32 = vld [vmem:[#allocation2 + $0x1e8] sm:$0xf0] }
  0x34   :  { %866 = vmatpush.bf16.msrb.mxu1 %v1219_v38  ;;  %v1307_v38 = vor.u32 %v1501_v35, %v1304_v36  ;;  %v1466_v35 = vld [vmem:[#allocation2 + $0x7c] sm:$0xf]  ;;  %v1164_v36 = vld [vmem:[#allocation2 + $0x94] sm:$0xf0] }
  0x38   :  { %867 = vmatpush.bf16.msrb.mxu1 %v1191_v54  ;;  %v1386_v54 = vld [vmem:[#allocation2 + $0x238] sm:$0xf] }
  0xa4   :  { %v150_v58 = vpop.f32.mrf.mxu0  ;;  %v163_v59 = vpop.f32.mrf.mxu1 }
  0xa5   :  { %v151_v60 = vadd.f32 %v150_v58, %v61_v56  ;;  %v164_v61 = vadd.f32 %v163_v59, %v62_v57  ;;  %v1468_v56 = vld [vmem:[#allocation2 + $0x88] sm:$0xf0]  ;;  %v1493_v58 = vld [vmem:[#allocation2 + $0x154] sm:$0xf]  ;;  %v1268_v59 = vld [vmem:[#allocation2 + $0x16c] sm:$0xf0] }
  0xa6   :  { %v1155_v57 = vor.u32 %v1468_v56, %v1154_v55  ;;  %v1159_v56 = vor.u32 %v1465_v52, %v1156_v53  ;;  %v607_v53 = vunpack.c.h.b16 %v1753_v17  ;;  %v1310_v17 = vld [vmem:[#allocation2 + $0x198] sm:$0xf] }
  0xa7   :  { %v167_v62 = vmul.f32 0.02, %v151_v60  ;;  %v168_v63 = vmul.f32 0.02, %v164_v61 }
  0xa8   :  { %816 = vmatpush.bf16.msra.mxu2 %v1155_v57  ;;  %v1525_v57 = vld [vmem:[#allocation2 + $0x250] sm:$0xf0] }
  0xa9   :  { %v1739_v0 = vmax.f32 %v151_v60, %v167_v62  ;;  %v1741_v1 = vmax.f32 %v164_v61, %v168_v63  ;;  %v1521_v60 = vld [vmem:[#allocation2 + $0x234] sm:$0xf]  ;;  %v1271_v61 = vor.u32 %v1493_v58, %v1268_v59  ;;  %v1380_v62 = vld [vmem:[#allocation2 + $0x24c] sm:$0xf0]  ;;  %v1162_v63 = vld [vmem:[#allocation2 + $0x78] sm:$0xf] }
  0xaa   :  { %v1487_v58 = vld [vmem:[#allocation2 + $0x124] sm:$0xf]  ;;  %v1248_v59 = vld [vmem:[#allocation2 + $0x13c] sm:$0xf0] }
  0xab   :  { %v172_v2 = vsel %vm171_vm3, %v1741_v1, 0.0  ;;  %v177_v6 = vmul.f32 %v1741_v1, %v1741_v1  ;;  %v176_v7 = vmul.f32 %v1739_v0, %v1739_v0  ;;  %838 = vmatpush.bf16.msrb.mxu3 %v1271_v61  ;;  %v1251_v61 = vor.u32 %v1487_v58, %v1248_v59 }
  0xac   :  { %v152_v3 = vpop.f32.mrf.mxu0  ;;  %v165_v4 = vpop.f32.mrf.mxu1  ;;  %v173_v5 = vadd.f32 %v172_v2, %v1739_v0  ;;  %v1469_v2 = vld [vmem:[#allocation2 + $0x90] sm:$0xf0] }
  0xad   :  { %v178_v8 = vsel %vm171_vm3, %v177_v6, 0.0  ;;  %v1383_v3 = vor.u32 %v1521_v60, %v1380_v62  ;;  %v1163_v4 = vor.u32 %v1469_v2, %v1162_v63  ;;  %v1461_v6 = vld [vmem:[#allocation2 + $0x50] sm:$0xf0]  ;;  %v1387_v60 = vor.u32 %v1525_v57, %v1386_v54  ;;  %v1394_v62 = vld [vmem:[#allocation2 + $0x240] sm:$0xf] }
  0xae   :  { %174 = vadd.xlane.f32.xlu0 %v173_v5  ;;  %v179_v9 = vadd.f32 %v178_v8, %v176_v7  ;;  %v1126_v5 = vld [vmem:[#allocation2 + $0x38] sm:$0xf]  ;;  %v1486_v8 = vld [vmem:[#allocation2 + $0x11c] sm:$0xf]  ;;  %v205_v57 = vperm.slane %v202_v49, 1 }
  0xaf   :  { %855 = vmatpush.bf16.msrb.mxu0 %v1383_v3  ;;  %v1127_v7 = vor.u32 %v1461_v6, %v1126_v5  ;;  %868 = vmatpush.bf16.msrb.mxu1 %v1163_v4  ;;  %v1526_v63 = vld [vmem:[#allocation2 + $0x258] sm:$0xf0]  ;;  %v1128_v4 = vld [vmem:[#allocation2 + $0x54] sm:$0xf0]  ;;  %v1358_v5 = vld [vmem:[#allocation2 + $0x200] sm:$0xf] }
  0xb0   :  { %v1395_v2 = vor.u32 %v1526_v63, %v1394_v62  ;;  %v1458_v3 = vld [vmem:[#allocation2 + $0x3c] sm:$0xf]  ;;  %v609_v63 = vunpack.c.h.b16 %v1755_v18  ;;  %v1282_v18 = vld [vmem:[#allocation2 + $0x160] sm:$0xf] }
  0xb1   :  { %817 = vmatpush.bf16.msra.mxu2 %v1127_v7  ;;  %v1131_v6 = vor.u32 %v1458_v3, %v1128_v4  ;;  %v1518_v7 = vld [vmem:[#allocation2 + $0x218] sm:$0xf0] }
  0xb3   :  { %856 = vmatpush.bf16.msrb.mxu0 %v1355_v15  ;;  %869 = vmatpush.bf16.msrb.mxu1 %v1135_v16  ;;  %v1367_v15 = vor.u32 %v1519_v14, %v1366_v13  ;;  %v1451_v16 = vld [vmem:[#allocation2 + $0x4] sm:$0xf]  ;;  %v1529_v13 = vld [vmem:[#allocation2 + $0x274] sm:$0xf]  ;;  %v1416_v14 = vld [vmem:[#allocation2 + $0x28c] sm:$0xf0] }
  0xb4   :  { %v1103_v22 = vor.u32 %v1451_v16, %v1100_v19  ;;  %v1498_v16 = vld [vmem:[#allocation2 + $0x178] sm:$0xf0]  ;;  %v1290_v19 = vld [vmem:[#allocation2 + $0x168] sm:$0xf] }
  0xb5   :  { %818 = vmatpush.bf16.msra.mxu2 %v1099_v23  ;;  %v1511_v23 = vld [vmem:[#allocation2 + $0x1e0] sm:$0xf0] }
  0xb6   :  { %180 = vadd.xlane.f32.xlu0 %v179_v9  ;;  %v1240_v9 = vld [vmem:[#allocation2 + $0x134] sm:$0xf0]  ;;  %v1331_v26 = vor.u32 %v1511_v23, %v1330_v20  ;;  %v1499_v20 = vld [vmem:[#allocation2 + $0x180] sm:$0xf0] }
  0xb7   :  { %v1243_v11 = vor.u32 %v1486_v8, %v1240_v9  ;;  %857 = vmatpush.bf16.msrb.mxu0 %v1327_v33  ;;  %870 = vmatpush.bf16.msrb.mxu1 %v1107_v34  ;;  %v1480_v8 = vld [vmem:[#allocation2 + $0xec] sm:$0xf]  ;;  %v1220_v9 = vld [vmem:[#allocation2 + $0x104] sm:$0xf0]  ;;  %v1339_v33 = vor.u32 %v1512_v32, %v1338_v30  ;;  %v1424_v23 = vld [vmem:[#allocation2 + $0x294] sm:$0xf0] }
  0xb8   :  { %v1223_v12 = vor.u32 %v1480_v8, %v1220_v9  ;;  %v1506_v8 = vld [vmem:[#allocation2 + $0x1b8] sm:$0xf0]  ;;  %v1491_v30 = vld [vmem:[#allocation2 + $0x140] sm:$0xf0] }
  0xb9   :  { %839 = vmatpush.bf16.msrb.mxu3 %v1243_v11  ;;  %879 = vmatpush.bf16.msrb.mxu2 %v797_v37  ;;  %v1359_v11 = vor.u32 %v1518_v7, %v1358_v5  ;;  %v1505_v5 = vld [vmem:[#allocation2 + $0x1b0] sm:$0xf0]  ;;  %v1318_v7 = vld [vmem:[#allocation2 + $0x1a0] sm:$0xf] }
  0xbb   :  { %889 = vmatpush.bf16.msra.mxu0 %v1307_v38  ;;  %931 = vmatpush.bf16.msra.mxu1 %v803_v39  ;;  %v1167_v38 = vor.u32 %v1466_v35, %v1164_v36  ;;  %v1459_v39 = vld [vmem:[#allocation2 + $0x44] sm:$0xf]  ;;  %v1396_v35 = vld [vmem:[#allocation2 + $0x25c] sm:$0xf0] }
  0xbc   :  { %v1139_v41 = vor.u32 %v1459_v39, %v1136_v40  ;;  %v1360_v39 = vld [vmem:[#allocation2 + $0x21c] sm:$0xf0] }
  0xbd   :  { %840 = vmatpush.bf16.msrb.mxu3 %v1215_v27  ;;  %880 = vmatpush.bf16.msrb.mxu2 %v1415_v47  ;;  %v1473_v27 = vld [vmem:[#allocation2 + $0xb4] sm:$0xf] }
  0xbe   :  { %v1195_v29 = vor.u32 %v1473_v27, %v1192_v28  ;;  %v1388_v27 = vld [vmem:[#allocation2 + $0x254] sm:$0xf0]  ;;  %v1291_v28 = vor.u32 %v1499_v20, %v1290_v19  ;;  %v1150_v19 = vld [vmem:[#allocation2 + $0x50] sm:$0xf]  ;;  %v1464_v20 = vld [vmem:[#allocation2 + $0x68] sm:$0xf0] }
  0xbf   :  { %890 = vmatpush.bf16.msra.mxu0 %v1279_v48  ;;  %932 = vmatpush.bf16.msra.mxu1 %v1423_v51  ;;  %v210_v51 = vld [vmem:[%s1824_s4] sm:$0x3] }
  0xc0   :  { %v212_v58 = vperm.slane %v210_v51, 0 }
  0xc1   :  { %841 = vmatpush.bf16.msrb.mxu3 %v1187_v43  ;;  %881 = vmatpush.bf16.msrb.mxu2 %v1387_v60  ;;  %v1108_v43 = vld [vmem:[#allocation2 + $0x24] sm:$0xf0]  ;;  %v213_v60 = vperm.slane %v210_v51, 1 }
  0xc2   :  { %v1111_v45 = vor.u32 %v1452_v42, %v1108_v43  ;;  %v1484_v42 = vld [vmem:[#allocation2 + $0x108] sm:$0xf0]  ;;  %v1234_v43 = vld [vmem:[#allocation2 + $0xf8] sm:$0xf]  ;;  %v1332_v51 = vld [vmem:[#allocation2 + $0x1e4] sm:$0xf0] }
  0xc3   :  { %891 = vmatpush.bf16.msra.mxu0 %v1251_v61  ;;  %933 = vmatpush.bf16.msra.mxu1 %v1395_v2  ;;  %v698_v2 = vpack.c.b16 %v607_v53, %v607_v53  ;;  %v1198_v53 = vld [vmem:[#allocation2 + $0xb8] sm:$0xf] }
  0xc5   :  { %842 = vmatpush.bf16.msrb.mxu3 %v1159_v56  ;;  %882 = vmatpush.bf16.msrb.mxu2 %v1359_v11  ;;  %v204_v56 = vperm.slane %v202_v49, 0  ;;  %v800_v9 = vsel %vm789_vm2, %v698_v2, 0 }
  0xc7   :  { %892 = vmatpush.bf16.msra.mxu0 %v1223_v12  ;;  %934 = vmatpush.bf16.msra.mxu1 %v1367_v15  ;;  %v1311_v12 = vor.u32 %v1505_v5, %v1310_v17  ;;  %v1319_v15 = vor.u32 %v1506_v8, %v1318_v7  ;;  %v1470_v17 = vld [vmem:[#allocation2 + $0x98] sm:$0xf0]  ;;  %v1495_v5 = vld [vmem:[#allocation2 + $0x164] sm:$0xf] }
  0xc8   :  { %v1471_v7 = vld [vmem:[#allocation2 + $0xa0] sm:$0xf0] }
  0xc9   :  { %843 = vmatpush.bf16.msrb.mxu3 %v1131_v6  ;;  %883 = vmatpush.bf16.msrb.mxu2 %v1331_v26  ;;  %v1522_v26 = vld [vmem:[#allocation2 + $0x23c] sm:$0xf] }
  0xca   :  { %v1391_v36 = vor.u32 %v1522_v26, %v1388_v27  ;;  %v1456_v26 = vld [vmem:[#allocation2 + $0x28] sm:$0xf0]  ;;  %v1481_v27 = vld [vmem:[#allocation2 + $0xf4] sm:$0xf] }
  0xcb   :  { %893 = vmatpush.bf16.msra.mxu0 %v1195_v29  ;;  %935 = vmatpush.bf16.msra.mxu1 %v1339_v33  ;;  %v1254_v29 = vld [vmem:[#allocation2 + $0x128] sm:$0xf]  ;;  %v1492_v33 = vld [vmem:[#allocation2 + $0x148] sm:$0xf0] }
  0xcd   :  { %844 = vmatpush.bf16.msrb.mxu3 %v1103_v22  ;;  %v1530_v22 = vld [vmem:[#allocation2 + $0x27c] sm:$0xf] }
  0xce   :  { %v1427_v32 = vor.u32 %v1530_v22, %v1424_v23 }
  0xcf   :  { %894 = vmatpush.bf16.msra.mxu0 %v1167_v38  ;;  %v1515_v38 = vld [vmem:[#allocation2 + $0x204] sm:$0xf] }
  0xd3   :  { %895 = vmatpush.bf16.msra.mxu0 %v1139_v41  ;;  %v1226_v41 = vld [vmem:[#allocation2 + $0xf0] sm:$0xf] }
  0xd4   :  { %v1227_v49 = vor.u32 %v1484_v42, %v1226_v41  ;;  %v1467_v42 = vld [vmem:[#allocation2 + $0x84] sm:$0xf] }
  0xd7   :  { %896 = vmatpush.bf16.msra.mxu0 %v1111_v45  ;;  %v1485_v45 = vld [vmem:[#allocation2 + $0x110] sm:$0xf0] }
 0x121   :  { %v175_v55 = vpop.xlane.xlu0 %174 }
 0x122   :  { %v1761_v10 = vmul.f32 0.005, %v175_v55 }
 0x124   :  { %v184_v24 = vmul.f32 %v1761_v10, %v1761_v10  ;;  %v187_v54 = vsub.f32 %v1739_v0, %v1761_v10  ;;  %v188_v55 = vsub.f32 %v1741_v1, %v1761_v10  ;;  %v700_v1 = vpack.c.b16 %v609_v63, %v609_v63 }
 0x129   :  { %v181_v21 = vpop.xlane.xlu0 %180 }
 0x12a   :  { %v183_v25 = vmul.f32 0.005, %v181_v21  ;;  %v806_v21 = vsel %vm789_vm2, %v700_v1, 0 }
 0x12c   :  { %v185_v31 = vsub.f32 %v183_v25, %v184_v24  ;;  %v1419_v24 = vor.u32 %v1529_v13, %v1416_v14  ;;  %v1283_v25 = vor.u32 %v1498_v16, %v1282_v18  ;;  %v1142_v14 = vld [vmem:[#allocation2 + $0x48] sm:$0xf]  ;;  %v1463_v18 = vld [vmem:[#allocation2 + $0x60] sm:$0xf0] }
 0x12d   :  { %v1256_v16 = vld [vmem:[#allocation2 + $0x144] sm:$0xf0]  ;;  %v1143_v22 = vor.u32 %v1463_v18, %v1142_v14 }
 0x12e   :  { %v186_v34 = vmax.f32 %v185_v31, 0.0  ;;  %v1262_v31 = vld [vmem:[#allocation2 + $0x130] sm:$0xf] }
 0x12f   :  { %v1263_v40 = vor.u32 %v1492_v33, %v1262_v31 }
 0x130   :  { %v189_v37 = vadd.f32 1e-05, %v186_v34  ;;  %v1523_v34 = vld [vmem:[#allocation2 + $0x244] sm:$0xf] }
 0x132   :  { %1539 = vrsqrt.f32 %v189_v37  ;;  %vm196_vm5 = vweird.f32 %v189_v37 }
 0x138   :  { %v1540_v44 = vpop.eup %1539 }
 0x139   :  { %v191_v46 = vmul.f32 %v1540_v44, %v189_v37  ;;  %vm197_vm4 = vweird.f32 %v1540_v44  ;;  %v1255_v37 = vor.u32 %v1491_v30, %v1254_v29  ;;  %v1122_v29 = vld [vmem:[#allocation2 + $0x18] sm:$0xf]  ;;  %v1457_v30 = vld [vmem:[#allocation2 + $0x30] sm:$0xf0] }
 0x13a   :  { %vm198_vm6 = vmor %vm196_vm5, %vm197_vm4 }
 0x13b   :  { %v192_v47 = vmul.f32 %v1540_v44, %v191_v46  ;;  %v1516_v46 = vld [vmem:[#allocation2 + $0x20c] sm:$0xf] }
 0x13d   :  { %v193_v48 = vmul.f32 0.5, %v192_v47  ;;  %v1368_v47 = vld [vmem:[#allocation2 + $0x224] sm:$0xf0] }
 0x13f   :  { %v194_v50 = vsub.f32 1.5, %v193_v48  ;;  %v1363_v48 = vor.u32 %v1515_v38, %v1360_v39  ;;  %v1430_v38 = vld [vmem:[#allocation2 + $0x280] sm:$0xf]  ;;  %v1534_v39 = vld [vmem:[#allocation2 + $0x298] sm:$0xf0] }
 0x140   :  { %v1431_v41 = vor.u32 %v1534_v39, %v1430_v38 }
 0x141   :  { %v195_v52 = vmul.f32 %v1540_v44, %v194_v50  ;;  %v1508_v50 = vld [vmem:[#allocation2 + $0x1cc] sm:$0xf] }
 0x143   :  { %v199_v59 = vsel %vm198_vm6, %v1540_v44, %v195_v52  ;;  %v1399_v44 = vor.u32 %v1523_v34, %v1396_v35  ;;  %v1235_v52 = vor.u32 %v1485_v45, %v1234_v43  ;;  %v1123_v34 = vor.u32 %v1457_v30, %v1122_v29  ;;  %v1474_v35 = vld [vmem:[#allocation2 + $0xbc] sm:$0xf]  ;;  %v1172_v43 = vld [vmem:[#allocation2 + $0x9c] sm:$0xf0]  ;;  %v1527_v45 = vld [vmem:[#allocation2 + $0x260] sm:$0xf0] }
 0x144   :  { %v200_v61 = vmul.f32 %v199_v59, %v187_v54  ;;  %v201_v62 = vmul.f32 %v199_v59, %v188_v55  ;;  %v1477_v54 = vld [vmem:[#allocation2 + $0xd0] sm:$0xf0]  ;;  %v1502_v55 = vld [vmem:[#allocation2 + $0x19c] sm:$0xf] }
 0x145   :  { %v1478_v59 = vld [vmem:[#allocation2 + $0xd8] sm:$0xf0]  ;;  %v1199_v63 = vor.u32 %v1477_v54, %v1198_v53  ;;  %v1453_v54 = vld [vmem:[#allocation2 + $0x14] sm:$0xf] }
 0x146   :  { %v208_v3 = vmul.f32 %v204_v56, %v200_v61  ;;  %v209_v4 = vmul.f32 %v205_v57, %v201_v62  ;;  %v1371_v56 = vor.u32 %v1516_v46, %v1368_v47  ;;  %v1312_v57 = vld [vmem:[#allocation2 + $0x1b4] sm:$0xf0]  ;;  %v1340_v61 = vld [vmem:[#allocation2 + $0x1ec] sm:$0xf0]  ;;  %v1335_v62 = vor.u32 %v1508_v50, %v1332_v51  ;;  %v1520_v51 = vld [vmem:[#allocation2 + $0x228] sm:$0xf0] }
 0x147   :  { %v1315_v2 = vor.u32 %v1502_v55, %v1312_v57  ;;  %v1175_v46 = vor.u32 %v1467_v42, %v1172_v43  ;;  %v1374_v50 = vld [vmem:[#allocation2 + $0x210] sm:$0xf]  ;;  %v1513_v57 = vld [vmem:[#allocation2 + $0x1f0] sm:$0xf0] }
 0x148   :  { %v216_v6 = vadd.f32 %v212_v58, %v208_v3  ;;  %v217_v0 = vadd.f32 %v213_v60, %v209_v4  ;;  %v1206_v58 = vld [vmem:[#allocation2 + $0xc0] sm:$0xf]  ;;  %v1509_v60 = vld [vmem:[#allocation2 + $0x1d4] sm:$0xf]  ;;  %v1375_v53 = vor.u32 %v1520_v51, %v1374_v50  ;;  %v1116_v55 = vld [vmem:[#allocation2 + $0x2c] sm:$0xf0] }
 0x149   :  { %v1207_v3 = vor.u32 %v1478_v59, %v1206_v58  ;;  %v1170_v4 = vld [vmem:[#allocation2 + $0x80] sm:$0xf]  ;;  %v1343_v8 = vor.u32 %v1509_v60, %v1340_v61  ;;  %v1119_v58 = vor.u32 %v1453_v54, %v1116_v55 }
 0x14a   :  { %v1778_v10 = vpack.c.bf16 %v216_v6, %v216_v6  ;;  %v1780_v11 = vpack.c.bf16 %v217_v0, %v217_v0  ;;  %v1284_v6 = vld [vmem:[#allocation2 + $0x17c] sm:$0xf0]  ;;  %v1178_v0 = vld [vmem:[#allocation2 + $0x88] sm:$0xf]  ;;  %v1171_v1 = vor.u32 %v1470_v17, %v1170_v4 }
 0x14b   :  { %v1179_v13 = vor.u32 %v1471_v7, %v1178_v0 }
 0x14c   :  { %819 = vmatmul.bf16.vlgmr.msra.gmra.mxu2 %v1778_v10  ;;  %1432 = vmatmul.msk.bf16.vlgmr.msra.gmra.mxu3 %vm171_vm3, %v1780_v11 }
 0x14d   :  { %1433 = vmatmul.msk.bf16.vlgmr.msrb.gmra.mxu0 %vm171_vm3, %v1780_v11  ;;  %871 = vmatmul.bf16.vlgmr.msrb.gmra.mxu1 %v1778_v10 }
 0x14e   :  { %905 = vmatpush.bf16.msra.mxu2 %v800_v9  ;;  %915 = vmatpush.bf16.msra.mxu3 %v1311_v12  ;;  %v319_v9 = vld [vmem:[#allocation2 + $0x2b8] sm:$0xf]  ;;  %v1287_v12 = vor.u32 %v1495_v5, %v1284_v6 }
 0x14f   :  { %967 = vmatpush.bf16.msrb.mxu1 %v1319_v15  ;;  %957 = vmatpush.bf16.msrb.mxu0 %v806_v21  ;;  %v1488_v15 = vld [vmem:[#allocation2 + $0x12c] sm:$0xf]  ;;  %v610_v21 = vunpack.c.l.b16 %v319_v9 }
 0x150   :  { %v1259_v23 = vor.u32 %v1488_v15, %v1256_v16 }
 0x151   :  { %v701_v31 = vpack.c.b16 %v610_v21, %v610_v21 }
 0x152   :  { %906 = vmatpush.bf16.msra.mxu2 %v1419_v24  ;;  %916 = vmatpush.bf16.msra.mxu3 %v1283_v25  ;;  %v1151_v24 = vor.u32 %v1464_v20, %v1150_v19  ;;  %v1114_v25 = vld [vmem:[#allocation2 + $0x10] sm:$0xf] }
 0x153   :  { %968 = vmatpush.bf16.msrb.mxu1 %v1291_v28  ;;  %958 = vmatpush.bf16.msrb.mxu0 %v1427_v32  ;;  %v1228_v28 = vld [vmem:[#allocation2 + $0x10c] sm:$0xf0]  ;;  %v1115_v32 = vor.u32 %v1456_v26, %v1114_v25 }
 0x154   :  { %v1231_v33 = vor.u32 %v1481_v27, %v1228_v28 }
 0x156   :  { %907 = vmatpush.bf16.msra.mxu2 %v1391_v36  ;;  %917 = vmatpush.bf16.msra.mxu3 %v1255_v37  ;;  %v1200_v36 = vld [vmem:[#allocation2 + $0xd4] sm:$0xf0]  ;;  %v809_v37 = vsel %vm789_vm2, %v701_v31, 0 }
 0x157   :  { %969 = vmatpush.bf16.msrb.mxu1 %v1263_v40  ;;  %959 = vmatpush.bf16.msrb.mxu0 %v1399_v44  ;;  %v1203_v40 = vor.u32 %v1474_v35, %v1200_v36  ;;  %v1402_v44 = vld [vmem:[#allocation2 + $0x248] sm:$0xf] }
 0x158   :  { %v1403_v47 = vor.u32 %v1527_v45, %v1402_v44 }
 0x15a   :  { %908 = vmatpush.bf16.msra.mxu2 %v1363_v48  ;;  %918 = vmatpush.bf16.msra.mxu3 %v1227_v49  ;;  %v1460_v48 = vld [vmem:[#allocation2 + $0x4c] sm:$0xf]  ;;  %v1144_v49 = vld [vmem:[#allocation2 + $0x64] sm:$0xf0] }
 0x15b   :  { %970 = vmatpush.bf16.msrb.mxu1 %v1235_v52  ;;  %960 = vmatpush.bf16.msrb.mxu0 %v1371_v56  ;;  %v1147_v52 = vor.u32 %v1460_v48, %v1144_v49  ;;  %v1346_v56 = vld [vmem:[#allocation2 + $0x1d8] sm:$0xf] }
 0x15c   :  { %845 = vmatmul.bf16.vlgmr.msrb.gmra.mxu3 %v1778_v10  ;;  %1434 = vmatmul.msk.bf16.vlgmr.msrb.gmra.mxu2 %vm171_vm3, %v1780_v11  ;;  %v1347_v59 = vor.u32 %v1513_v57, %v1346_v56 }
 0x15d   :  { %897 = vmatmul.bf16.vlgmr.msra.gmra.mxu0 %v1778_v10  ;;  %1436 = vmatmul.msk.bf16.vlgmr.msra.gmra.mxu1 %vm171_vm3, %v1780_v11 }
 0x15e   :  { %909 = vmatpush.bf16.msra.mxu2 %v1335_v62  ;;  %919 = vmatpush.bf16.msra.mxu3 %v1199_v63  ;;  %v1808_v62 = vld [vmem:[%s1826_s6] sm:$0x7f]  ;;  %s1610_s6 = smov [#allocation5]  }
 0x15f   :  { %971 = vmatpush.bf16.msrb.mxu1 %v1207_v3  ;;  %961 = vmatpush.bf16.msrb.mxu0 %v1343_v8  ;;  %v322_v63 = vperm.slane %v1808_v62, 0  ;;  %v325_v29 = vperm.slane %v1808_v62, 3  ;;  %v326_v36 = vperm.slane %v1808_v62, 4  ;;  %v327_v56 = vperm.slane %v1808_v62, 5  ;;  %s1034_s14 = sshll.u32 %s1610_s6, 4  ;;  %s1035_s14 = int_to_ptr.vmem [resolvable:$true] %s1034_s14 }
 0x162   :  { %941 = vmatpush.bf16.msrb.mxu2 %v1315_v2  ;;  %920 = vmatpush.bf16.msra.mxu3 %v1171_v1 }
 0x163   :  { %972 = vmatpush.bf16.msrb.mxu1 %v1179_v13 }
 0x166   :  { %942 = vmatpush.bf16.msrb.mxu2 %v1287_v12  ;;  %921 = vmatpush.bf16.msra.mxu3 %v1143_v22  ;;  %v323_v12 = vperm.slane %v1808_v62, 1 }
 0x167   :  { %973 = vmatpush.bf16.msrb.mxu1 %v1151_v24 }
 0x16a   :  { %943 = vmatpush.bf16.msrb.mxu2 %v1259_v23  ;;  %922 = vmatpush.bf16.msra.mxu3 %v1115_v32 }
 0x16b   :  { %974 = vmatpush.bf16.msrb.mxu1 %v1123_v34 }
 0x16c   :  { %1435 = vmatmul.msk.bf16.vlgmr.msra.gmra.mxu2 %vm171_vm3, %v1780_v11 }
 0x16d   :  { %923 = vmatmul.bf16.vlgmr.msra.gmra.mxu3 %v1778_v10  ;;  %1437 = vmatmul.msk.bf16.vlgmr.msrb.gmra.mxu0 %vm171_vm3, %v1780_v11 }
 0x16e   :  { %944 = vmatpush.bf16.msrb.mxu2 %v1231_v33  ;;  %983 = vmatpush.bf16.msrb.mxu3 %v809_v37 }
 0x16f   :  { %975 = vmatmul.bf16.vlgmr.msrb.gmra.mxu1 %v1778_v10 }
 0x172   :  { %945 = vmatpush.bf16.msrb.mxu2 %v1203_v40  ;;  %984 = vmatpush.bf16.msrb.mxu3 %v1431_v41 }
 0x176   :  { %946 = vmatpush.bf16.msrb.mxu2 %v1175_v46  ;;  %985 = vmatpush.bf16.msrb.mxu3 %v1403_v47 }
 0x17a   :  { %947 = vmatpush.bf16.msrb.mxu2 %v1147_v52  ;;  %986 = vmatpush.bf16.msrb.mxu3 %v1375_v53  ;;  %v328_v53 = vperm.slane %v1808_v62, 6 }
 0x17e   :  { %948 = vmatpush.bf16.msrb.mxu2 %v1119_v58  ;;  %987 = vmatpush.bf16.msrb.mxu3 %v1347_v59 }
 0x181   :  { %949 = vmatmul.bf16.vlgmr.msrb.gmra.mxu2 %v1778_v10  ;;  %1438 = vmatmul.msk.bf16.vlgmr.msrb.gmra.mxu3 %vm171_vm3, %v1780_v11  ;;  %v324_v11 = vperm.slane %v1808_v62, 2 }
 0x1ca   :  { %v859_v60 = vpop.f32.mrf.mxu0  ;;  %v872_v61 = vpop.f32.mrf.mxu1 }
 0x1cb   :  { %v873_v14 = vadd.f32 %v872_v61, %v324_v11 }
 0x1cf   :  { %v820_v2 = vpop.f32.mrf.mxu2  ;;  %v833_v3 = vpop.f32.mrf.mxu3 }
 0x1d0   :  { %v821_v4 = vadd.f32 %v820_v2, %v322_v63 }
 0x1d2   :  { %v834_v17 = vadd.f32 %v833_v3, %v821_v4  ;;  %v861_v5 = vpop.f32.mrf.mxu0  ;;  %v874_v6 = vpop.f32.mrf.mxu1 }
 0x1d4   :  { %v993_v0 = vmul.f32 0.5, %v834_v17 }
 0x1d6   :  { %1541 = vtanh.f32 %v993_v0 }
 0x1d7   :  { %v822_v10 = vpop.f32.mrf.mxu2  ;;  %v835_v7 = vpop.f32.mrf.mxu3 }
 0x1da   :  { %v898_v8 = vpop.f32.mrf.mxu0  ;;  %v937_v1 = vpop.f32.mrf.mxu1 }
 0x1db   :  { %v899_v37 = vadd.f32 %v898_v8, %v325_v29 }
 0x1dc   :  { %v1542_v9 = vpop.eup %1541 }
 0x1dd   :  { %v1007_v13 = vmul.f32 0.5, %v1542_v9 }
 0x1df   :  { %v1014_v18 = vadd.f32 0.5, %v1007_v13  ;;  %v846_v15 = vpop.f32.mrf.mxu3  ;;  %v885_v16 = vpop.f32.mrf.mxu2 }
 0x1e0   :  { %v847_v19 = vadd.f32 %v846_v15, %v323_v12  ;;  %v886_v20 = vadd.f32 %v885_v16, %v873_v14 }
 0x1e1   :  { %1021 = vst [vmem:[#allocation5] sm:$0xff] %v1014_v18 }
 0x1e2   :  { %v860_v21 = vadd.f32 %v859_v60, %v847_v19  ;;  %v995_v22 = vmul.f32 0.5, %v886_v20  ;;  %v900_v23 = vpop.f32.mrf.mxu0  ;;  %v939_v24 = vpop.f32.mrf.mxu1 }
 0x1e4   :  { %v994_v25 = vmul.f32 0.5, %v860_v21  ;;  %1543 = vtanh.f32 %v995_v22 }
 0x1e6   :  { %1545 = vtanh.f32 %v994_v25 }
 0x1e7   :  { %v848_v26 = vpop.f32.mrf.mxu3  ;;  %v887_v27 = vpop.f32.mrf.mxu2 }
 0x1ea   :  { %v1544_v28 = vpop.eup %1543  ;;  %v963_v30 = vpop.f32.mrf.mxu0 }
 0x1eb   :  { %v1009_v31 = vmul.f32 0.5, %v1544_v28 }
 0x1ec   :  { %v976_v32 = vpop.f32.mrf.mxu1  ;;  %v1546_v33 = vpop.eup %1545 }
 0x1ed   :  { %v1008_v34 = vmul.f32 0.5, %v1546_v33  ;;  %v1016_v35 = vadd.f32 0.5, %v1009_v31  ;;  %v977_v58 = vadd.f32 %v976_v32, %v328_v53 }
 0x1ef   :  { %v1015_v38 = vadd.f32 0.5, %v1008_v34  ;;  %1023 = vst [vmem:[#allocation5 + $0x10] sm:$0xff] %v1016_v35  ;;  %v911_v39 = vpop.f32.mrf.mxu2 }
 0x1f0   :  { %v912_v40 = vadd.f32 %v911_v39, %v899_v37  ;;  %v924_v41 = vpop.f32.mrf.mxu3 }
 0x1f1   :  { %1022 = vst [vmem:[#allocation5 + $0x8] sm:$0xff] %v1015_v38  ;;  %v925_v42 = vadd.f32 %v924_v41, %v326_v36 }
 0x1f2   :  { %v996_v43 = vmul.f32 0.5, %v912_v40  ;;  %v965_v44 = vpop.f32.mrf.mxu0 }
 0x1f3   :  { %v938_v45 = vadd.f32 %v937_v1, %v925_v42 }
 0x1f4   :  { %v978_v46 = vpop.f32.mrf.mxu1  ;;  %1547 = vtanh.f32 %v996_v43 }
 0x1f5   :  { %v997_v47 = vmul.f32 0.5, %v938_v45 }
 0x1f7   :  { %1549 = vtanh.f32 %v997_v47  ;;  %v913_v48 = vpop.f32.mrf.mxu2 }
 0x1f8   :  { %v926_v49 = vpop.f32.mrf.mxu3 }
 0x1fa   :  { %v1548_v50 = vpop.eup %1547 }
 0x1fb   :  { %v1010_v51 = vmul.f32 0.5, %v1548_v50 }
 0x1fd   :  { %v1550_v52 = vpop.eup %1549  ;;  %v1017_v54 = vadd.f32 0.5, %v1010_v51 }
 0x1fe   :  { %v1011_v55 = vmul.f32 0.5, %v1550_v52 }
 0x1ff   :  { %1024 = vst [vmem:[#allocation5 + $0x18] sm:$0xff] %v1017_v54 }
 0x200   :  { %v1018_v57 = vadd.f32 0.5, %v1011_v55 }
 0x202   :  { %1025 = vst [vmem:[#allocation5 + $0x20] sm:$0xff] %v1018_v57 }
 0x204   :  { %v950_v59 = vpop.f32.mrf.mxu2  ;;  %v989_v61 = vpop.f32.mrf.mxu3 }
 0x205   :  { %v951_v60 = vadd.f32 %v950_v59, %v327_v56  ;;  %v990_v63 = vadd.f32 %v989_v61, %v977_v58 }
 0x207   :  { %v964_v2 = vadd.f32 %v963_v30, %v951_v60  ;;  %v999_v3 = vmul.f32 0.5, %v990_v63 }
 0x209   :  { %v998_v4 = vmul.f32 0.5, %v964_v2  ;;  %1551 = vtanh.f32 %v999_v3 }
 0x20b   :  { %1553 = vtanh.f32 %v998_v4 }
 0x20c   :  { %v952_v17 = vpop.f32.mrf.mxu2  ;;  %v991_v5 = vpop.f32.mrf.mxu3 }
 0x20f   :  { %v1552_v6 = vpop.eup %1551 }
 0x210   :  { %v1013_v10 = vmul.f32 0.5, %v1552_v6 }
 0x211   :  { %v1554_v0 = vpop.eup %1553 }
 0x212   :  { %v1012_v62 = vmul.f32 0.5, %v1554_v0  ;;  %v1020_v7 = vadd.f32 0.5, %v1013_v10 }
 0x214   :  { %v1019_v11 = vadd.f32 0.5, %v1012_v62  ;;  %1028 = vst.msk [vmem:[#allocation5 + $0x30] sm:$0xff] %vm1027_vm7, %v1020_v7 }
 0x216   :  { %1026 = vst [vmem:[#allocation5 + $0x28] sm:$0xff] %v1019_v11 }
 0x217   :  { %1039 = dma.vmem_to_hbm [thread:$0]  %s1035_s14, 896, %s1037_s17, [#allocation4]  }
 0x218   :  { %1605 = dma.done.wait [#allocation4], 896  }
 0x219   :  { %1606 = vsyncadd [#allocation4], 4294966400 }
 0x21a   :  { %1044 = vsyncpa [#allocation3], 1 }
 0x21b   :  { %1045 = vsyncpa [#allocation4], 1 }

</bundles_post_ra>
